<compile_context>
chip_gen: v7x
topology: tpu7x:2x2x1
jax: 0.10.0
libtpu: 0.0.40
codegen_flags: <defaults>
</compile_context>

<pallas_src>
import math

import jax
import jax.numpy as jnp
from jax import lax
from jax.experimental import pallas as pl
from jax.experimental.pallas import tpu as pltpu


# ---------------------------------------------------------------------------
# Per-generation tuning knobs.
# ---------------------------------------------------------------------------
def _hw_params():
    """VMEM limit + tile preferences derived from the local TPU generation."""
    try:
        kind = jax.devices()[0].device_kind.lower()
    except Exception:  # defensive: fall back to conservative settings
        kind = ""
    if "v7" in kind:      # 64 MiB physical VMEM per core -> leave headroom
        return dict(vmem=48 << 20, lane=256, tq=(256, 128), tkv=(256, 128),
                    tm=(512, 256, 128), tn=(512, 256, 128))
    if "v6" in kind:      # 128 MiB VMEM, 256-wide MXU
        return dict(vmem=96 << 20, lane=256, tq=(256, 128), tkv=(256, 128),
                    tm=(1024, 512, 256, 128), tn=(512, 256, 128))
    if "v5" in kind:      # 128 MiB VMEM, 128-wide MXU, single vst slot
        return dict(vmem=64 << 20, lane=128, tq=(128,), tkv=(256, 128),
                    tm=(1024, 512, 256, 128), tn=(512, 256, 128))
    return dict(vmem=48 << 20, lane=128, tq=(128,), tkv=(256, 128),
                tm=(512, 256, 128), tn=(512, 256, 128))


def _round_up(n, m):
    return ((n + m - 1) // m) * m


def _pick_tile(n, prefs, align):
    """Largest preferred tile dividing n, else the largest `align`-aligned
    divisor of n not exceeding the preferences, else the full extent."""
    for p in prefs:
        if n % p == 0:
            return p
    cap = min(n, max(prefs))
    for d in range(cap - cap % align, align - 1, -align):
        if n % d == 0:
            return d
    return n


def _pick_head_group(heads, dk, lane_target):
    """Heads packed per flash grid step.  hb*dk must be a multiple of 128 (so
    a block narrower than the array's last dim stays lane-legal) or hb==heads
    (block spans the whole d_model axis)."""
    legal = [hb for hb in range(heads, 0, -1)
             if heads % hb == 0 and ((hb * dk) % 128 == 0 or hb == heads)]
    for hb in legal:                       # descending width
        if hb * dk <= lane_target:
            return hb
    return legal[-1]


def _pad_rows(x, target):
    if x.shape[1] == target:
        return x
    return jnp.pad(x, ((0, 0), (0, target - x.shape[1]), (0, 0)))


# ---------------------------------------------------------------------------
# Linear projection kernel:  y = x @ Wt + b   (Wt already transposed)
# ---------------------------------------------------------------------------
def _linear_kernel(x_ref, wt_ref, b_ref, o_ref):
    acc = jnp.dot(x_ref[...], wt_ref[...], preferred_element_type=jnp.float32)
    o_ref[...] = (acc + b_ref[...]).astype(o_ref.dtype)


def _linear(x, wt, b, hw):
    """x: (M, Din), wt: (Din, Dout) pre-transposed, b: (1, Dout) float32."""
    M, Din = x.shape
    Dout = wt.shape[1]
    tm = _pick_tile(M, hw["tm"], 8)
    tn = _pick_tile(Dout, hw["tn"], 128)
    n_blocks, m_blocks = Dout // tn, M // tm
    itemsize = x.dtype.itemsize
    cost = pl.CostEstimate(
        flops=2 * M * Din * Dout,
        transcendentals=0,
        bytes_accessed=(M * Din * n_blocks + Din * Dout + M * Dout) * itemsize
        + Dout * 4,
    )
    # Grid: output-column blocks outer (weight tile stays resident across the
    # inner row sweep), row blocks inner.
    # TODO(synk): single-buffer the resident weight/bias (pl.Buffered(1)) and
    #             tile the contraction axis (Din) for very large d_model.
    return pl.pallas_call(
        _linear_kernel,
        out_shape=jax.ShapeDtypeStruct((M, Dout), x.dtype),
        grid_spec=pltpu.PrefetchScalarGridSpec(
            num_scalar_prefetch=0,
            grid=(n_blocks, m_blocks),
            in_specs=[
                pl.BlockSpec((tm, Din), lambda j, i: (i, 0)),
                pl.BlockSpec((Din, tn), lambda j, i: (0, j)),
                pl.BlockSpec((1, tn), lambda j, i: (0, j)),
            ],
            out_specs=pl.BlockSpec((tm, tn), lambda j, i: (i, j)),
        ),
        compiler_params=pltpu.CompilerParams(
            dimension_semantics=("parallel", "parallel"),
            vmem_limit_bytes=hw["vmem"],
        ),
        cost_estimate=cost,
    )(x, wt, b)


# ---------------------------------------------------------------------------
# Flash-attention kernel (online softmax), Hb heads per grid step, reading
# head columns directly from the projected (and possibly fused) tensors.
# ---------------------------------------------------------------------------
def _make_flash_kernel(hb, dk, tq, tkv, kv_len, kv_total):
    W = hb * dk
    need_mask = kv_len < kv_total   # padded kv tail must not enter the softmax

    def kernel(q_ref, k_ref, v_ref, o_ref, m_sc, l_sc, acc_sc):
        ki = pl.program_id(3)

        @pl.when(ki == 0)
        def _init():
            m_sc[...] = jnp.full(m_sc.shape, -jnp.inf, dtype=m_sc.dtype)
            l_sc[...] = jnp.zeros(l_sc.shape, dtype=l_sc.dtype)
            acc_sc[...] = jnp.zeros(acc_sc.shape, dtype=acc_sc.dtype)

        q = q_ref[0]          # (tq, W)  -- 1/sqrt(d_k) folded into q proj
        k = k_ref[0]          # (tkv, W)
        v = v_ref[0]          # (tkv, W)

        if need_mask:
            col = ki * tkv + lax.broadcasted_iota(jnp.int32, (1, tkv), 1)
            kv_ok = col < kv_len            # (1, tkv)

        for h in range(hb):
            sl = slice(h * dk, (h + 1) * dk)
            # Scores block for head h: contract over d_k, no explicit transpose.
            s = lax.dot_general(q[:, sl], k[:, sl], (((1,), (1,)), ((), ())),
                                preferred_element_type=jnp.float32)  # (tq,tkv)
            if need_mask:
                s = jnp.where(kv_ok, s, -1e9)
            m_prev = m_sc[h][:, :1]                          # (tq, 1)
            m_new = jnp.maximum(m_prev, jnp.max(s, axis=-1, keepdims=True))
            alpha = jnp.exp(m_prev - m_new)                  # (tq, 1)
            p = jnp.exp(s - m_new)                           # (tq, tkv)
            l_sc[h] = jnp.broadcast_to(
                alpha * l_sc[h][:, :1] + jnp.sum(p, axis=-1, keepdims=True),
                (tq, 128))
            m_sc[h] = jnp.broadcast_to(m_new, (tq, 128))
            pv = jnp.dot(p.astype(v.dtype), v[:, sl],
                         preferred_element_type=jnp.float32)  # (tq, dk)
            acc_sc[:, sl] = alpha * acc_sc[:, sl] + pv

        @pl.when(ki == pl.num_programs(3) - 1)
        def _finalize():
            # Approx EUP reciprocal only on the bf16 output path (within its
            # noise floor); exact otherwise to hold the f32 tolerance.
            approx = o_ref.dtype == jnp.bfloat16
            for h in range(hb):
                sl = slice(h * dk, (h + 1) * dk)
                inv = pl.reciprocal(l_sc[h][:, :1], approx=approx)
                acc_sc[:, sl] = acc_sc[:, sl] * inv
            o_ref[0] = acc_sc[...].astype(o_ref.dtype)       # lane-dense store

    return kernel


def _flash_attention(qp, kp, vp, *, heads, dk, hb, k_col0, v_col0, kv_len, hw):
    """qp/kp/vp: projected activations (may alias the same fused array).
    Head h of q/k/v lives in columns [base + h*dk, base + (h+1)*dk) of the
    respective array (base = 0 / k_col0 / v_col0).  The output is written
    directly in (B, Sq, d_model) "concat" layout."""
    B, Sqp, _ = qp.shape
    _, Skvp, _ = kp.shape
    D = heads * dk
    W = hb * dk
    n_groups = heads // hb
    tq = _pick_tile(Sqp, hw["tq"], 8)
    tkv = _pick_tile(Skvp, hw["tkv"], 8)
    k_g0 = k_col0 // W
    v_g0 = v_col0 // W

    itemsize = qp.dtype.itemsize
    cost = pl.CostEstimate(
        flops=4 * B * heads * Sqp * Skvp * dk,
        transcendentals=B * heads * Sqp * Skvp,
        # q read once, K/V re-read once per q-block, output written once.
        bytes_accessed=(B * Sqp * D
                        + 2 * B * Skvp * D * (Sqp // tq)
                        + B * Sqp * D) * itemsize,
    )
    kernel = _make_flash_kernel(hb, dk, tq, tkv, kv_len, Skvp)
    return pl.pallas_call(
        kernel,
        out_shape=jax.ShapeDtypeStruct((B, Sqp, D), qp.dtype),
        grid_spec=pltpu.PrefetchScalarGridSpec(
            num_scalar_prefetch=0,
            grid=(B, n_groups, Sqp // tq, Skvp // tkv),
            in_specs=[
                pl.BlockSpec((1, tq, W), lambda b, g, qi, ki: (b, qi, g)),
                pl.BlockSpec((1, tkv, W),
                             lambda b, g, qi, ki: (b, ki, k_g0 + g)),
                pl.BlockSpec((1, tkv, W),
                             lambda b, g, qi, ki: (b, ki, v_g0 + g)),
            ],
            out_specs=pl.BlockSpec((1, tq, W),
                                   lambda b, g, qi, ki: (b, qi, g)),
            scratch_shapes=[
                pltpu.VMEM((hb, tq, 128), jnp.float32),   # running max m
                pltpu.VMEM((hb, tq, 128), jnp.float32),   # running denom l
                pltpu.VMEM((tq, W), jnp.float32),         # output accumulator
            ],
        ),
        compiler_params=pltpu.CompilerParams(
            dimension_semantics=("parallel", "parallel", "parallel",
                                 "arbitrary"),
            vmem_limit_bytes=hw["vmem"],
        ),
        cost_estimate=cost,
    )(qp, kp, vp)


# ---------------------------------------------------------------------------
# Module forward
# ---------------------------------------------------------------------------
def multi_head_attention(q, k, v, params, *, heads):
    """q: (B, Sq, D); k, v: (B, Skv, D).  params: wq,bq,wk,bk,wv,bv,wo,bo."""
    B, Sq, D = q.shape
    _, Skv, _ = k.shape
    assert D % heads == 0
    dk = D // heads
    dt = q.dtype
    scale = 1.0 / math.sqrt(dk)
    hw = _hw_params()

    # Pre-transpose nn.Linear weights (one-time, host-side) and fold the
    # softmax scale into the q projection.  Biases stay f32 for accumulation.
    wqt = (params["wq"].T * scale).astype(dt)
    wkt = params["wk"].T.astype(dt)
    wvt = params["wv"].T.astype(dt)
    wot = params["wo"].T.astype(dt)
    bq = (params["bq"] * scale).astype(jnp.float32).reshape(1, D)
    bk = params["bk"].astype(jnp.float32).reshape(1, D)
    bv = params["bv"].astype(jnp.float32).reshape(1, D)
    bo = params["bo"].astype(jnp.float32).reshape(1, D)

    Sqp = _round_up(Sq, 8)
    Skvp = _round_up(Skv, 8)

    hb = _pick_head_group(heads, dk, hw["lane"])
    W = hb * dk
    # A block narrower than the array's last dim needs a 128-multiple width;
    # otherwise blocks must span the full d_model axis of per-tensor arrays.
    packed = (W % 128 == 0)

    same_qkv = (q is k) and (k is v)       # self-attention: fuse Q/K/V proj
    same_kv = (k is v)                     # common case: fuse K/V proj

    if same_qkv:
        x2d = _pad_rows(q, Sqp).reshape(B * Sqp, D)
        wf = jnp.concatenate([wqt, wkt, wvt], axis=1)       # (D, 3D)
        bf = jnp.concatenate([bq, bk, bv], axis=1)          # (1, 3D)
        proj = _linear(x2d, wf, bf, hw).reshape(B, Sqp, 3 * D)
        if packed:
            qp = kp = vp = proj
            k_col0, v_col0 = D, 2 * D
        else:  # small/odd d_model: present per-tensor (B, S, D) slabs
            qp, kp, vp = proj[..., :D], proj[..., D:2 * D], proj[..., 2 * D:]
            k_col0 = v_col0 = 0
    elif same_kv:
        qp = _linear(_pad_rows(q, Sqp).reshape(B * Sqp, D), wqt, bq, hw)
        qp = qp.reshape(B, Sqp, D)
        wf = jnp.concatenate([wkt, wvt], axis=1)             # (D, 2D)
        bf = jnp.concatenate([bk, bv], axis=1)
        kvp = _linear(_pad_rows(k, Skvp).reshape(B * Skvp, D), wf, bf, hw)
        kvp = kvp.reshape(B, Skvp, 2 * D)
        if packed:
            kp = vp = kvp
            k_col0, v_col0 = 0, D
        else:
            kp, vp = kvp[..., :D], kvp[..., D:]
            k_col0 = v_col0 = 0
    else:
        qp = _linear(_pad_rows(q, Sqp).reshape(B * Sqp, D), wqt, bq, hw)
        qp = qp.reshape(B, Sqp, D)
        kp = _linear(_pad_rows(k, Skvp).reshape(B * Skvp, D), wkt, bk, hw)
        kp = kp.reshape(B, Skvp, D)
        vp = _linear(_pad_rows(v, Skvp).reshape(B * Skvp, D), wvt, bv, hw)
        vp = vp.reshape(B, Skvp, D)
        k_col0 = v_col0 = 0

    # ctx comes back already in (B, Sq_pad, D) "concat" layout.
    ctx = _flash_attention(qp, kp, vp, heads=heads, dk=dk, hb=hb,
                           k_col0=k_col0, v_col0=v_col0, kv_len=Skv, hw=hw)

    out = _linear(ctx.reshape(B * Sqp, D), wot, bo, hw).reshape(B, Sqp, D)
    if Sqp != Sq:
        out = out[:, :Sq, :]
    return out


# ---------------------------------------------------------------------------
# Params + pure-JAX reference
# ---------------------------------------------------------------------------
def init_params(key, d_model):
    """Deterministic nn.Linear-style init (uniform +- 1/sqrt(fan_in))."""
    bound = 1.0 / math.sqrt(d_model)
    keys = jax.random.split(key, 8)

    def u(k, shape):
        return jax.random.uniform(k, shape, jnp.float32, -bound, bound)

    return {
        "wq": u(keys[0], (d_model, d_model)), "bq": u(keys[1], (d_model,)),
        "wk": u(keys[2], (d_model, d_model)), "bk": u(keys[3], (d_model,)),
        "wv": u(keys[4], (d_model, d_model)), "bv": u(keys[5], (d_model,)),
        "wo": u(keys[6], (d_model, d_model)), "bo": u(keys[7], (d_model,)),
    }


def mha_reference(q, k, v, params, *, heads):
    """Pure-JAX reference mirroring the PyTorch forward (eval mode)."""
    B, _, D = q.shape
    d_k = D // heads

    def lin(x, w, b):
        return x @ w.T + b

    def split(x):
        return x.reshape(B, -1, heads, d_k).transpose(0, 2, 1, 3)

    qh = split(lin(q, params["wq"], params["bq"]))
    kh = split(lin(k, params["wk"], params["bk"]))
    vh = split(lin(v, params["wv"], params["bv"]))
    scores = jnp.einsum("bhqd,bhkd->bhqk", qh, kh) / math.sqrt(d_k)
    attn = jax.nn.softmax(scores, axis=-1)
    ctx = jnp.einsum("bhqk,bhkd->bhqd", attn, vh)
    concat = ctx.transpose(0, 2, 1, 3).reshape(B, -1, D)
    return lin(concat, params["wo"], params["bo"])


if __name__ == "__main__":
    B, S, D, H = 2, 8, 32, 4

    key = jax.random.PRNGKey(0)
    kq, kk, kv_, kp_, kx = jax.random.split(key, 5)
    q = jax.random.normal(kq, (B, S, D), jnp.float32)
    k = jax.random.normal(kk, (B, S, D), jnp.float32)
    v = jax.random.normal(kv_, (B, S, D), jnp.float32)
    params = init_params(kp_, D)

    # 1) General cross-attention (distinct q/k/v -> separate projections), f32.
    ref = mha_reference(q, k, v, params, heads=H)
    out = jax.block_until_ready(multi_head_attention(q, k, v, params, heads=H))
    assert out.shape == (B, S, D)
    assert jnp.allclose(out, ref, atol=1e-4, rtol=1e-4), "f32 mismatch (cross)"

    # 2) Self-attention (q is k is v -> fused QKV projection), f32.
    x = jax.random.normal(kx, (B, S, D), jnp.float32)
    ref_self = mha_reference(x, x, x, params, heads=H)
    out_self = jax.block_until_ready(
        multi_head_attention(x, x, x, params, heads=H))
    assert jnp.allclose(out_self, ref_self, atol=1e-4, rtol=1e-4), \
        "f32 mismatch (self, fused QKV)"

    # 3) Unaligned lengths (k is v -> fused KV proj; exercises seq padding and
    #    the in-kernel masking of the padded kv tail), f32.
    q3 = jax.random.normal(kq, (B, 10, D), jnp.float32)
    kv3 = jax.random.normal(kk, (B, 12, D), jnp.float32)
    ref3 = mha_reference(q3, kv3, kv3, params, heads=H)
    out3 = jax.block_until_ready(
        multi_head_attention(q3, kv3, kv3, params, heads=H))
    assert out3.shape == (B, 10, D)
    assert jnp.allclose(out3, ref3, atol=1e-4, rtol=1e-4), \
        "f32 mismatch (padded/masked)"

    # 4) bf16 self-attention (MXU-native operands, f32 accumulation).
    xb = x.astype(jnp.bfloat16)
    out_bf16 = jax.block_until_ready(
        multi_head_attention(xb, xb, xb, params, heads=H))
    assert out_bf16.shape == (B, S, D)
    assert jnp.allclose(out_bf16.astype(jnp.float32), ref_self,
                        atol=1e-1, rtol=1e-1), "bf16 mismatch vs reference"

    print("KERNEL_OK")
</pallas_src>

<mosaic_0001>
module attributes {stable_mosaic.version = 11 : i64} {
  func.func @_linear_kernel(%arg0: i32, %arg1: i32, %arg2: memref<16x32xf32, #tpu.memory_space<vmem>>, %arg3: memref<32x32xf32, #tpu.memory_space<vmem>>, %arg4: memref<1x32xf32, #tpu.memory_space<vmem>>, %arg5: memref<16x32xf32, #tpu.memory_space<vmem>>) attributes {dimension_semantics = [#tpu.dimension_semantics<parallel>, #tpu.dimension_semantics<parallel>], iteration_bounds = array<i64: 1, 1>, scalar_prefetch = 0 : i64, scratch_operands = 0 : i64, tpu.core_type = #tpu.core_type<tc>, window_params = [{transform_indices = @transform_0, window_bounds = array<i64: 16, 32>}, {transform_indices = @transform_1, window_bounds = array<i64: 32, 32>}, {transform_indices = @transform_2, window_bounds = array<i64: 1, 32>}, {transform_indices = @transform_3, window_bounds = array<i64: 16, 32>}]} {
    %c0 = arith.constant 0 : index
    %c0_0 = arith.constant 0 : index
    %0 = vector.load %arg2[%c0, %c0_0] : memref<16x32xf32, #tpu.memory_space<vmem>>, vector<16x32xf32>
    %c0_1 = arith.constant 0 : index
    %c0_2 = arith.constant 0 : index
    %1 = vector.load %arg3[%c0_1, %c0_2] : memref<32x32xf32, #tpu.memory_space<vmem>>, vector<32x32xf32>
    %cst = arith.constant dense<0.000000e+00> : vector<16x32xf32>
    %2 = tpu.matmul %0, %1, %cst {dimension_numbers = #tpu.dot_dimension_numbers<[1], [0], [0], [1], [0, 0, 1, 1], [], []>} : vector<16x32xf32>, vector<32x32xf32>, vector<16x32xf32> -> vector<16x32xf32>
    %c0_3 = arith.constant 0 : index
    %c0_4 = arith.constant 0 : index
    %3 = vector.load %arg4[%c0_3, %c0_4] : memref<1x32xf32, #tpu.memory_space<vmem>>, vector<1x32xf32>
    %4 = vector.broadcast %3 : vector<1x32xf32> to vector<16x32xf32>
    %5 = arith.addf %2, %4 : vector<16x32xf32>
    %c0_5 = arith.constant 0 : index
    %c0_6 = arith.constant 0 : index
    %6 = vector.load %arg5[%c0_5, %c0_6] : memref<16x32xf32, #tpu.memory_space<vmem>>, vector<16x32xf32>
    tpu.vector_store %arg5[%c0_5, %c0_6], %5 {strides = array<i32>} : memref<16x32xf32, #tpu.memory_space<vmem>>, vector<16x32xf32>,
    return
  }
  func.func @transform_0(%arg0: i32, %arg1: i32) -> (i32, i32) {
    %c0_i32 = arith.constant 0 : i32
    %c0_i32_0 = arith.constant 0 : i32
    return %arg1, %c0_i32 : i32, i32
  }
  func.func @transform_1(%arg0: i32, %arg1: i32) -> (i32, i32) {
    %c0_i32 = arith.constant 0 : i32
    %c0_i32_0 = arith.constant 0 : i32
    return %c0_i32, %arg0 : i32, i32
  }
  func.func @transform_2(%arg0: i32, %arg1: i32) -> (i32, i32) {
    %c0_i32 = arith.constant 0 : i32
    %c0_i32_0 = arith.constant 0 : i32
    return %c0_i32, %arg0 : i32, i32
  }
  func.func @transform_3(%arg0: i32, %arg1: i32) -> (i32, i32) {
    %c0_i32 = arith.constant 0 : i32
    return %arg1, %arg0 : i32, i32
  }
}

</mosaic_0001>

<bundles_post_ra>
// kernel: tpu_custom_call.1
= control target key start
LH: loop header
LB: loop body
LE: loop exit
PB: predicated region body
PF: predicated region fallthrough
CT: control target
= control target key end

     0   :  { %8 = vsyncpa [#allocation3], 0  ;;  %s340_s0 = inlined_call_operand.hbm [shape: f32[16,32], index: 0, kind: input, shape index: {}]   ;;  %s341_s1 = inlined_call_operand.hbm [shape: f32[32,32], index: 1, kind: input, shape index: {}]   ;;  %s342_s2 = inlined_call_operand.vmem [shape: f32[1,32], index: 2, kind: input, shape index: {}]   ;;  %s343_s3 = inlined_call_operand.hbm [shape: f32[16,32], index: 3, kind: output, shape index: {}]  }
   0x1   :  { %9 = vsyncpa [#allocation6], 0 }
   0x2   :  { %10 = vsyncpa [#allocation4], 0  ;;  %s263_s12 = smov [#allocation2]   ;;  %s191_s16 = scalar_lea.hbm %s340_s0, 256 }
   0x3   :  { %s16_s13 = sshll.u32 %s263_s12, 4  ;;  %p192_p0 = scmp.ne.s32.totalorder %s340_s0, %s191_s16  ;;  %s17_s13 = int_to_ptr.vmem [resolvable:$true] %s16_s13 }
   0x4   :  { %p195_p1 = scmp.lt.u32.totalorder %s191_s16, %s340_s0 }
   0x6   :  { %p197_p2 = pnand %p195_p1, %p192_p0 }
   0x8   :  { %200 = shalt.err (!%p197_p2)
}
   0x9   :  { %s201_s21 = scalar_lea.vmem %s17_s13, 256  ;;  %p206_p4 = scmp.lt.s32.totalorder %s17_s13, %s17_s13 }
   0xa   :  { %p202_p3 = scmp.ne.s32.totalorder %s17_s13, %s201_s21  ;;  %p207_p5 = scmp.lt.s32.totalorder %s201_s21, %s201_s21 }
   0xc   :  { %p208_p6 = por %p207_p5, %p206_p4 }
   0xe   :  { %p209_p7 = pnand %p208_p6, %p202_p3 }
  0x10   :  { %212 = shalt.err (!%p209_p7)
}
  0x11   :  { %s264_s22 = smov 128   ;;  %s265_s23 = smov 8  }
  0x12   :  { %22 = dma.hbm_to_vmem [thread:$0]  %s340_s0, 256, %s17_s13, [#allocation3], %s264_s22, %s264_s22, %s265_s23  }
  0x13   :  { %s266_s26 = smov [#allocation5]   ;;  %s213_s30 = scalar_lea.hbm %s341_s1, 512 }
  0x14   :  { %s28_s27 = sshll.u32 %s266_s26, 4  ;;  %p214_p8 = scmp.ne.s32.totalorder %s341_s1, %s213_s30  ;;  %s29_s27 = int_to_ptr.vmem [resolvable:$true] %s28_s27 }
  0x15   :  { %p217_p9 = scmp.lt.u32.totalorder %s213_s30, %s341_s1 }
  0x17   :  { %p219_p10 = pnand %p217_p9, %p214_p8 }
  0x19   :  { %222 = shalt.err (!%p219_p10)
}
  0x1a   :  { %s223_s8 = scalar_lea.vmem %s29_s27, 512  ;;  %p228_p12 = scmp.lt.s32.totalorder %s29_s27, %s29_s27 }
  0x1b   :  { %p224_p11 = scmp.ne.s32.totalorder %s29_s27, %s223_s8  ;;  %p229_p13 = scmp.lt.s32.totalorder %s223_s8, %s223_s8 }
  0x1d   :  { %p230_p0 = por %p229_p13, %p228_p12 }
  0x1f   :  { %p231_p1 = pnand %p230_p0, %p224_p11 }
  0x21   :  { %234 = shalt.err (!%p231_p1)
}
  0x22   :  { %34 = dma.hbm_to_vmem [thread:$0]  %s341_s1, 512, %s29_s27, [#allocation6], %s264_s22, %s264_s22, %s265_s23  }
  0x23   :  { %257 = dma.done.wait [#allocation3], 256  }
  0x24   :  { %258 = vsyncadd [#allocation3], 4294967040 }
  0x25   :  { %259 = dma.done.wait [#allocation6], 512  }
  0x26   :  { %260 = vsyncadd [#allocation6], 4294966784  ;;  %vm56_vm0 = vcmask 261120   ;;  %v45_v0 = vld [vmem:[#allocation5] sm:$0xff]  ;;  %v46_v1 = vld [vmem:[#allocation5 + $0x8] sm:$0xff]  ;;  %s267_s11 = smov [#allocation7]  }
  0x27   :  { %v47_v2 = vld [vmem:[#allocation5 + $0x10] sm:$0xff]  ;;  %v178_v3 = vpack.c.bf16 %v46_v1, %v45_v0  ;;  %v48_v4 = vld [vmem:[#allocation5 + $0x18] sm:$0xff]  ;;  %s145_s12 = sshll.u32 %s267_s11, 4  ;;  %s146_s12 = int_to_ptr.vmem [resolvable:$true] %s145_s12 }
  0x28   :  { %v43_v5 = vld [vmem:[#allocation2] sm:$0xff]  ;;  %v182_v6 = vpack.c.bf16 %v48_v4, %v47_v2  ;;  %v44_v7 = vld [vmem:[#allocation2 + $0x8] sm:$0xff]  ;;  %s235_s13 = scalar_lea.vmem %s146_s12, 256  ;;  %p240_p3 = scmp.lt.s32.totalorder %s146_s12, %s146_s12 }
  0x29   :  { %175 = vmatprep.mubr.msk.f32.mxu0 %vm56_vm0, %v43_v5  ;;  %179 = vmatprep.subr.bf16.mxu0 %v178_v3  ;;  %v158_v8 = vld [vmem:[%s342_s2] ss:$0 sm:$0xff]  ;;  %p236_p2 = scmp.ne.s32.totalorder %s146_s12, %s235_s13  ;;  %p241_p4 = scmp.lt.s32.totalorder %s235_s13, %s235_s13 }
  0x2a   :  { %181 = vmatpush3.bf16.msra.mxu0 %v178_v3 }
  0x2b   :  { %183 = vmatprep.subr.bf16.mxu0 %v182_v6  ;;  %p242_p5 = por %p241_p4, %p240_p3 }
  0x2d   :  { %p243_p6 = pnand %p242_p5, %p236_p2 }
  0x2e   :  { %185 = vmatpush3.bf16.msra.mxu0 %v182_v6 }
  0x31   :  { %176 = vmatmul.mubr.msk.f32.vlgmr.msra.gmra.mrb[0].mxu0 %vm56_vm0, %v44_v7 }
 0x104   :  { %v177_v9 = vpop.f32.mrb[0].mxu0 }
 0x105   :  { %v135_v10 = vadd.f32 %v177_v9, %v158_v8  ;;  %v129_v11 = vpop.f32.mrb[1].mxu0 }
 0x106   :  { %v130_v12 = vadd.f32 %v158_v8, %v129_v11 }
 0x107   :  { %139 = vst.msk [vmem:[#allocation7 + $0x8] sm:$0xff] %vm56_vm0, %v135_v10 }
 0x108   :  { %138 = vst.msk [vmem:[#allocation7] sm:$0xff] %vm56_vm0, %v130_v12 }
 0x109   :  { %246 = shalt.err (!%p243_p6)
}
 0x10a   :  { %s247_s15 = scalar_lea.hbm %s343_s3, 256 }
 0x10b   :  { %p248_p7 = scmp.ne.s32.totalorder %s343_s3, %s247_s15  ;;  %p251_p8 = scmp.lt.u32.totalorder %s247_s15, %s343_s3 }
 0x10d   :  { %p253_p9 = pnand %p251_p8, %p248_p7 }
 0x10f   :  { %256 = shalt.err (!%p253_p9)
}
 0x110   :  { %151 = dma.vmem_to_hbm [thread:$0]  %s146_s12, 256, %s343_s3, [#allocation4], %s264_s22, %s264_s22, %s265_s23  }
 0x111   :  { %261 = dma.done.wait [#allocation4], 256  }
 0x112   :  { %262 = vsyncadd [#allocation4], 4294967040 }
 0x113   :  { %155 = vsyncpa [#allocation3], 1 }
 0x114   :  { %156 = vsyncpa [#allocation6], 1 }
 0x115   :  { %157 = vsyncpa [#allocation4], 1 }

</bundles_post_ra>
